<compile_context>
chip_gen: v5e
topology: v5e:2x2
jax: 0.10.0
libtpu: 0.0.40
codegen_flags: <defaults>
</compile_context>

<pallas_src>
import functools

import jax
import jax.numpy as jnp
import numpy as np
from jax.experimental import pallas as pl
from jax.experimental.pallas import tpu as pltpu


def _lf_kernel(xh_ref, x_ref, lf2c_ref,
               w1a_ref, w1b_ref, b1_ref,
               w2a_ref, w2b_ref, b2_ref, g_ref,
               out_ref, *, Bp, eps):
    """One time-tile of fused conv1 -> conv2 -> residual -> RMSNorm.

    xh_ref  : [2*Bp, D]  x at tile-times (-2, -1); rows [0:Bp)=t-2, [Bp:2Bp)=t-1
    x_ref   : [T*Bp, D]  this tile's inputs (flattened time x batch), compute dtype
    lf2c_ref: [Bp, D2]   lf2 cache (= conv1 output at global time -1), f32
    w1a/w1b : [D, D2]    conv1 taps (previous / current time step)
    w2a/w2b : [D2, D]    conv2 taps (previous / current time step)
    b1      : [1, D2]    b2, g : [1, D]  (f32)
    out_ref : [T*Bp, D]  RMSNorm(conv2(conv1(x)) + x)
    """
    f32 = jnp.float32
    TB = x_ref.shape[0]
    x = x_ref[...]
    xh = xh_ref[...]
    cdt = x.dtype

    w1a = w1a_ref[...]
    w1b = w1b_ref[...]
    w2a = w2a_ref[...]
    w2b = w2b_ref[...]
    b1 = b1_ref[...]
    b2 = b2_ref[...]

    # ---- conv1, kernel (2,1): o1[t] = x[t-1] @ w1a + x[t] @ w1b + b1 --------------
    o1 = jnp.dot(x, w1b, preferred_element_type=f32) + b1                   # [TB, D2]
    prev_head = jnp.dot(xh[Bp:2 * Bp, :], w1a, preferred_element_type=f32)  # halo t-1
    if TB > Bp:
        prev_tail = jnp.dot(x[0:TB - Bp, :], w1a, preferred_element_type=f32)
        o1 = o1 + jnp.concatenate([prev_head, prev_tail], axis=0)
    else:
        o1 = o1 + prev_head

    # ---- conv2 needs o1 at tile-time -1: the lf2 cache for the first tile, and a
    # cheap recompute from the 2-step x halo otherwise (keeps the grid parallel).
    o1_halo = (jnp.dot(xh[0:Bp, :], w1a, preferred_element_type=f32)
               + jnp.dot(xh[Bp:2 * Bp, :], w1b, preferred_element_type=f32)
               + b1)                                                        # [Bp, D2]
    o1_halo = jnp.where(pl.program_id(0) == 0, lf2c_ref[...].astype(f32), o1_halo)

    o1_c = o1.astype(cdt)
    if TB > Bp:
        o1_prev = jnp.concatenate([o1_halo.astype(cdt), o1_c[0:TB - Bp, :]], axis=0)
    else:
        o1_prev = o1_halo.astype(cdt)

    # ---- conv2, kernel (2,1): o2[t] = o1[t-1] @ w2a + o1[t] @ w2b + b2 ------------
    o2 = (jnp.dot(o1_prev, w2a, preferred_element_type=f32)
          + jnp.dot(o1_c, w2b, preferred_element_type=f32)
          + b2)                                                             # [TB, D]

    # ---- residual + RMSNorm (all f32 on the VPU/EUP) ------------------------------
    out3 = o2 + x.astype(f32)
    var = jnp.mean(out3 * out3, axis=-1, keepdims=True)
    normed = out3 * jax.lax.rsqrt(var + eps)
    out_ref[...] = (g_ref[...] * normed).astype(out_ref.dtype)


def _round_up(x, m):
    return (x + m - 1) // m * m


def _choose_time_tile(S, Bp, D, in_bytes, out_bytes, budget_bytes=12 * 2**20):
    # Streamed bytes per time step, double-buffered: x tile in + out tile out.
    per_step = Bp * D * 2 * (in_bytes + out_bytes)
    return int(max(1, min(S, budget_bytes // max(per_step, 1))))


def localized_filtering_pallas(inputs_sbd, lf1_cache, lf2_cache, params, eps,
                               compute_dtype=jnp.bfloat16, time_tile=None):
    """inputs_sbd: [S, B, D] time-major (already left-padded if prefill)."""
    S, B, D = inputs_sbd.shape
    assert D % 2 == 0
    D2 = D // 2
    out_dtype = params["ln_w"].dtype

    # Pad batch rows to a sublane multiple so the B-row time shift is (8,128) aligned.
    Bp = _round_up(B, 8)
    pb = Bp - B
    x_p = jnp.pad(inputs_sbd, ((0, 0), (0, pb), (0, 0)))              # [S, Bp, D]
    lf1_p = jnp.pad(lf1_cache[:, :, 0, 0], ((0, pb), (0, 0)))         # [Bp, D]
    lf2_p = jnp.pad(lf2_cache[:, :, 0, 0], ((0, pb), (0, 0)))         # [Bp, D2]

    in_bytes = jnp.dtype(compute_dtype).itemsize
    out_bytes = jnp.dtype(out_dtype).itemsize
    T = int(time_tile) if time_tile is not None else _choose_time_tile(
        S, Bp, D, in_bytes, out_bytes)
    NB = -(-S // T)
    S_pad = NB * T

    # Main streamed operand: inputs, right-padded on time to a tile multiple (the
    # padded tail rows produce garbage that is sliced off below).
    x_main = jnp.pad(x_p, ((0, S_pad - S), (0, 0), (0, 0)))
    x_main = x_main.reshape(S_pad * Bp, D).astype(compute_dtype)

    # Per-tile halo: x at tile-times (-2, -1).  For tile 0, time -1 is the lf1 cache
    # and time -2 is a dummy row (its conv1 result is replaced by the lf2 cache).
    x_ext = jnp.concatenate(
        [jnp.zeros((1, Bp, D), x_p.dtype), lf1_p[None], x_p], axis=0)  # times -2..S-1
    h_idx = np.stack([np.arange(NB) * T, np.arange(NB) * T + 1], axis=1).reshape(-1)
    halos = jnp.take(x_ext, jnp.asarray(h_idx), axis=0)               # [2*NB, Bp, D]
    halos = halos.reshape(NB * 2 * Bp, D).astype(compute_dtype)

    # Weights in the MXU compute dtype; biases / gain / cache in f32.
    w1a = params["conv1_w"][:, :, 0, 0].T.astype(compute_dtype)       # [D, D2]
    w1b = params["conv1_w"][:, :, 1, 0].T.astype(compute_dtype)
    w2a = params["conv2_w"][:, :, 0, 0].T.astype(compute_dtype)       # [D2, D]
    w2b = params["conv2_w"][:, :, 1, 0].T.astype(compute_dtype)
    b1 = params["conv1_b"][None, :].astype(jnp.float32)
    b2 = params["conv2_b"][None, :].astype(jnp.float32)
    g = params["ln_w"][None, :].astype(jnp.float32)
    lf2_in = lf2_p.astype(jnp.float32)

    kernel = functools.partial(_lf_kernel, Bp=Bp, eps=float(eps))
    const = lambda i: (0, 0)

    flops = 8 * S_pad * Bp * D * D2 + 10 * NB * Bp * D * D2
    bytes_accessed = (x_main.size * in_bytes + halos.size * in_bytes
                      + 4 * D * D2 * in_bytes + S_pad * Bp * D * out_bytes)
    cost = pl.CostEstimate(flops=int(flops), transcendentals=int(S_pad * Bp),
                           bytes_accessed=int(bytes_accessed))

    # Explicit VMEM budget: double-buffered streamed tiles + resident weights + slack.
    est = (2 * (T * Bp * D * (in_bytes + out_bytes) + 2 * Bp * D * in_bytes)
           + 2 * 4 * D * D2 * in_bytes
           + 6 * T * Bp * (D + D2) * 4)
    vmem_limit = int(min(max(est, 32 * 2**20), 48 * 2**20))

    out = pl.pallas_call(
        kernel,
        out_shape=jax.ShapeDtypeStruct((S_pad * Bp, D), out_dtype),
        grid_spec=pltpu.PrefetchScalarGridSpec(
            num_scalar_prefetch=0,
            grid=(NB,),
            in_specs=[
                pl.BlockSpec((2 * Bp, D), lambda i: (i, 0)),    # x halo (2 steps)
                pl.BlockSpec((T * Bp, D), lambda i: (i, 0)),    # x tile (streamed)
                pl.BlockSpec((Bp, D2), const),                  # lf2 cache (resident)
                pl.BlockSpec((D, D2), const),                   # w1a (resident)
                pl.BlockSpec((D, D2), const),                   # w1b
                pl.BlockSpec((1, D2), const),                   # b1
                pl.BlockSpec((D2, D), const),                   # w2a
                pl.BlockSpec((D2, D), const),                   # w2b
                pl.BlockSpec((1, D), const),                    # b2
                pl.BlockSpec((1, D), const),                    # rmsnorm gain
            ],
            out_specs=pl.BlockSpec((T * Bp, D), lambda i: (i, 0)),
        ),
        compiler_params=pltpu.CompilerParams(
            dimension_semantics=("parallel",),
            vmem_limit_bytes=vmem_limit),
        cost_estimate=cost,
    )(halos, x_main, lf2_in, w1a, w1b, b1, w2a, w2b, b2, g)

    lf_out_sbd = out.reshape(S_pad, Bp, D)[:S, :B, :]                 # [S, B, D]

    # New caches: only the last time step is needed, so compute that single conv1 row
    # with a tiny f32 matmul here instead of writing the full conv1 output to HBM.
    w1a_f = params["conv1_w"][:, :, 0, 0].T
    w1b_f = params["conv1_w"][:, :, 1, 0].T
    x_last = inputs_sbd[S - 1]                                        # [B, D]
    x_prev = inputs_sbd[S - 2] if S >= 2 else lf1_cache[:, :, 0, 0]
    lf2_row = (jnp.dot(x_prev, w1a_f) + jnp.dot(x_last, w1b_f)
               + params["conv1_b"][None, :])                          # [B, D2]
    lf1_new = x_last.reshape(B, D, 1, 1)
    lf2_new = lf2_row.reshape(B, D2, 1, 1)
    return lf_out_sbd, lf1_new, lf2_new


def localized_filtering_forward(inputs, lf1_cache, lf2_cache, params,
                                seq_lens=None, eps=1e-6,
                                compute_dtype=jnp.bfloat16, time_tile=None):
    """Full module forward.  inputs: [num_tokens, D]."""
    D = inputs.shape[-1]
    B = lf1_cache.shape[0]

    if seq_lens is not None:
        # Prefill: left-pad every sequence to max_len with ONE gather + mask
        # (no per-sequence pad/concat HLOs).
        seq_lens = [int(l) for l in seq_lens]
        max_len = max(seq_lens)
        offs = np.cumsum([0] + seq_lens)
        j = np.arange(max_len)[None, :]
        lens = np.asarray(seq_lens)[:, None]
        idx = offs[:-1][:, None] + j - (max_len - lens)
        valid = idx >= offs[:-1][:, None]
        idx = np.clip(idx, 0, inputs.shape[0] - 1)
        x_bsd = jnp.take(inputs, jnp.asarray(idx.reshape(-1)), axis=0)
        x_bsd = x_bsd.reshape(B, max_len, D)
        x_bsd = x_bsd * jnp.asarray(valid[:, :, None], dtype=inputs.dtype)
    else:
        x_bsd = inputs.reshape(B, -1, D)

    inputs_sbd = jnp.transpose(x_bsd, (1, 0, 2))                      # [S, B, D]
    lf_out_sbd, lf1_new, lf2_new = localized_filtering_pallas(
        inputs_sbd, lf1_cache, lf2_cache, params, eps,
        compute_dtype=compute_dtype, time_tile=time_tile)

    lf_output = jnp.transpose(lf_out_sbd, (1, 0, 2))                  # [B, S, D]
    if seq_lens is not None:
        # Un-pad: one gather of the last l_i rows of each sequence.
        S = lf_output.shape[1]
        out_idx = np.concatenate(
            [i * S + np.arange(S - l, S) for i, l in enumerate(seq_lens)])
        lf_output = jnp.take(lf_output.reshape(B * S, D),
                             jnp.asarray(out_idx), axis=0)
    else:
        lf_output = lf_output.reshape(-1, D)
    return lf_output, lf1_new, lf2_new


def reference_forward(inputs, lf1_cache, lf2_cache, params, seq_lens, eps=1e-6):
    """Pure-JAX f32 mirror of the PyTorch forward (NCHW convs via einsum)."""
    D = inputs.shape[-1]
    B = lf1_cache.shape[0]
    if seq_lens is not None:
        max_len = max(seq_lens)
        offs = np.cumsum([0] + list(seq_lens))
        subs = [jnp.pad(inputs[offs[i]:offs[i + 1]], ((max_len - l, 0), (0, 0)))
                for i, l in enumerate(seq_lens)]
        inputs = jnp.concatenate(subs, axis=0)
    inputs = jnp.transpose(inputs.reshape(B, -1, D), (1, 0, 2))       # [S, B, D]
    residual = inputs
    S = inputs.shape[0]
    x = jnp.transpose(inputs[:, None, :, :], (2, 3, 0, 1))            # [B, D, S, 1]
    x = jnp.concatenate([lf1_cache, x], axis=2)                       # [B, D, S+1, 1]
    w1, b1 = params["conv1_w"], params["conv1_b"]
    w2, b2 = params["conv2_w"], params["conv2_b"]
    xh = x[..., 0]
    o1 = (jnp.einsum('oc,nch->noh', w1[:, :, 0, 0], xh[:, :, :-1])
          + jnp.einsum('oc,nch->noh', w1[:, :, 1, 0], xh[:, :, 1:])
          + b1[None, :, None])[..., None]                             # [B, D2, S, 1]
    o1c = jnp.concatenate([lf2_cache, o1], axis=2)                    # [B, D2, S+1, 1]
    o1h = o1c[..., 0]
    o2 = (jnp.einsum('oc,nch->noh', w2[:, :, 0, 0], o1h[:, :, :-1])
          + jnp.einsum('oc,nch->noh', w2[:, :, 1, 0], o1h[:, :, 1:])
          + b2[None, :, None])[..., None]                             # [B, D, S, 1]
    o2 = jnp.transpose(o2, (2, 3, 0, 1)).reshape(S, B, D)
    out3 = o2 + residual
    var = jnp.mean(out3.astype(jnp.float32) ** 2, axis=-1, keepdims=True)
    out3 = out3 * jax.lax.rsqrt(var + eps)
    lf_output = params["ln_w"] * out3
    lf_output = jnp.transpose(lf_output, (1, 0, 2))                   # [B, S, D]
    lf1 = x[:, :, -1:, :]
    lf2 = o1c[:, :, -1:, :]
    if seq_lens is not None:
        pieces = [lf_output[i, -l:] for i, l in enumerate(seq_lens)]
        lf_output = jnp.concatenate(pieces, axis=0)
    return lf_output.reshape(-1, D), lf1, lf2


if __name__ == "__main__":
    D = 32          # hidden_size (embed_dim)
    D2 = D // 2
    B = 2           # number of sequences (lf cache batch dim)
    seq_lens = [8, 5]
    num_tokens = sum(seq_lens)
    eps = 1e-6

    key = jax.random.PRNGKey(0)
    keys = jax.random.split(key, 8)
    params = {
        "conv1_w": jax.random.normal(keys[0], (D2, D, 2, 1), jnp.float32) * 0.1,
        "conv1_b": jax.random.normal(keys[1], (D2,), jnp.float32) * 0.1,
        "conv2_w": jax.random.normal(keys[2], (D, D2, 2, 1), jnp.float32) * 0.1,
        "conv2_b": jax.random.normal(keys[3], (D,), jnp.float32) * 0.1,
        "ln_w": jnp.ones((D,), jnp.float32),
    }
    inputs = jax.random.normal(keys[4], (num_tokens, D), jnp.float32)
    lf1_cache = jax.random.normal(keys[5], (B, D, 1, 1), jnp.float32)
    lf2_cache = jax.random.normal(keys[6], (B, D2, 1, 1), jnp.float32)

    # ---- prefill path (variable-length sequences, left padded) ----
    lf_out, lf1_new, lf2_new = localized_filtering_forward(
        inputs, lf1_cache, lf2_cache, params, seq_lens=seq_lens, eps=eps)
    jax.block_until_ready((lf_out, lf1_new, lf2_new))

    ref_out, ref_lf1, ref_lf2 = reference_forward(
        inputs, lf1_cache, lf2_cache, params, seq_lens, eps=eps)
    np.testing.assert_allclose(np.asarray(lf_out), np.asarray(ref_out),
                               rtol=2e-2, atol=2e-2)
    np.testing.assert_allclose(np.asarray(lf1_new), np.asarray(ref_lf1),
                               rtol=1e-5, atol=1e-5)
    np.testing.assert_allclose(np.asarray(lf2_new), np.asarray(ref_lf2),
                               rtol=1e-4, atol=1e-4)
    assert lf_out.shape == (num_tokens, D)
    assert lf1_new.shape == (B, D, 1, 1)
    assert lf2_new.shape == (B, D2, 1, 1)

    # ---- decode path (one token per sequence, consumes the new caches) ----
    dec_in = jax.random.normal(keys[7], (B, D), jnp.float32)
    d_out, d_lf1, d_lf2 = localized_filtering_forward(
        dec_in, lf1_new, lf2_new, params, seq_lens=None, eps=eps)
    jax.block_until_ready((d_out, d_lf1, d_lf2))
    r_out, r_lf1, r_lf2 = reference_forward(
        dec_in, lf1_new, lf2_new, params, None, eps=eps)
    np.testing.assert_allclose(np.asarray(d_out), np.asarray(r_out),
                               rtol=2e-2, atol=2e-2)
    np.testing.assert_allclose(np.asarray(d_lf1), np.asarray(r_lf1),
                               rtol=1e-5, atol=1e-5)
    np.testing.assert_allclose(np.asarray(d_lf2), np.asarray(r_lf2),
                               rtol=1e-4, atol=1e-4)

    print("KERNEL_OK")
</pallas_src>

<mosaic_0001>
module attributes {stable_mosaic.version = 11 : i64} {
  func.func @_lf_kernel(%arg0: i32, %arg1: memref<16x32xbf16, #tpu.memory_space<vmem>>, %arg2: memref<64x32xbf16, #tpu.memory_space<vmem>>, %arg3: memref<8x16xf32, #tpu.memory_space<vmem>>, %arg4: memref<32x16xbf16, #tpu.memory_space<vmem>>, %arg5: memref<32x16xbf16, #tpu.memory_space<vmem>>, %arg6: memref<1x16xf32, #tpu.memory_space<vmem>>, %arg7: memref<16x32xbf16, #tpu.memory_space<vmem>>, %arg8: memref<16x32xbf16, #tpu.memory_space<vmem>>, %arg9: memref<1x32xf32, #tpu.memory_space<vmem>>, %arg10: memref<1x32xf32, #tpu.memory_space<vmem>>, %arg11: memref<64x32xf32, #tpu.memory_space<vmem>>) attributes {dimension_semantics = [#tpu.dimension_semantics<parallel>], iteration_bounds = array<i64: 1>, scalar_prefetch = 0 : i64, scratch_operands = 0 : i64, tpu.core_type = #tpu.core_type<tc>, window_params = [{transform_indices = @transform_0, window_bounds = array<i64: 16, 32>}, {transform_indices = @transform_1, window_bounds = array<i64: 64, 32>}, {pipeline_mode = #tpu.pipeline_mode<synchronous>, transform_indices = @transform_2, window_bounds = array<i64: 8, 16>}, {pipeline_mode = #tpu.pipeline_mode<synchronous>, transform_indices = @transform_3, window_bounds = array<i64: 32, 16>}, {pipeline_mode = #tpu.pipeline_mode<synchronous>, transform_indices = @transform_4, window_bounds = array<i64: 32, 16>}, {pipeline_mode = #tpu.pipeline_mode<synchronous>, transform_indices = @transform_5, window_bounds = array<i64: 1, 16>}, {pipeline_mode = #tpu.pipeline_mode<synchronous>, transform_indices = @transform_6, window_bounds = array<i64: 16, 32>}, {pipeline_mode = #tpu.pipeline_mode<synchronous>, transform_indices = @transform_7, window_bounds = array<i64: 16, 32>}, {pipeline_mode = #tpu.pipeline_mode<synchronous>, transform_indices = @transform_8, window_bounds = array<i64: 1, 32>}, {pipeline_mode = #tpu.pipeline_mode<synchronous>, transform_indices = @transform_9, window_bounds = array<i64: 1, 32>}, {transform_indices = @transform_10, window_bounds = array<i64: 64, 32>}]} {
    %c0 = arith.constant 0 : index
    %c0_0 = arith.constant 0 : index
    %0 = vector.load %arg2[%c0, %c0_0] : memref<64x32xbf16, #tpu.memory_space<vmem>>, vector<64x32xbf16>
    %c0_1 = arith.constant 0 : index
    %c0_2 = arith.constant 0 : index
    %1 = vector.load %arg1[%c0_1, %c0_2] : memref<16x32xbf16, #tpu.memory_space<vmem>>, vector<16x32xbf16>
    %c0_3 = arith.constant 0 : index
    %c0_4 = arith.constant 0 : index
    %2 = vector.load %arg4[%c0_3, %c0_4] : memref<32x16xbf16, #tpu.memory_space<vmem>>, vector<32x16xbf16>
    %c0_5 = arith.constant 0 : index
    %c0_6 = arith.constant 0 : index
    %3 = vector.load %arg5[%c0_5, %c0_6] : memref<32x16xbf16, #tpu.memory_space<vmem>>, vector<32x16xbf16>
    %c0_7 = arith.constant 0 : index
    %c0_8 = arith.constant 0 : index
    %4 = vector.load %arg7[%c0_7, %c0_8] : memref<16x32xbf16, #tpu.memory_space<vmem>>, vector<16x32xbf16>
    %c0_9 = arith.constant 0 : index
    %c0_10 = arith.constant 0 : index
    %5 = vector.load %arg8[%c0_9, %c0_10] : memref<16x32xbf16, #tpu.memory_space<vmem>>, vector<16x32xbf16>
    %c0_11 = arith.constant 0 : index
    %c0_12 = arith.constant 0 : index
    %6 = vector.load %arg6[%c0_11, %c0_12] : memref<1x16xf32, #tpu.memory_space<vmem>>, vector<1x16xf32>
    %c0_13 = arith.constant 0 : index
    %c0_14 = arith.constant 0 : index
    %7 = vector.load %arg9[%c0_13, %c0_14] : memref<1x32xf32, #tpu.memory_space<vmem>>, vector<1x32xf32>
    %cst = arith.constant dense<0.000000e+00> : vector<64x16xf32>
    %8 = tpu.matmul %0, %3, %cst {dimension_numbers = #tpu.dot_dimension_numbers<[1], [0], [0], [1], [0, 0, 1, 1], [], []>} : vector<64x32xbf16>, vector<32x16xbf16>, vector<64x16xf32> -> vector<64x16xf32>
    %9 = vector.broadcast %6 : vector<1x16xf32> to vector<64x16xf32>
    %10 = arith.addf %8, %9 : vector<64x16xf32>
    %11 = vector.extract_strided_slice %1 {offsets = [8, 0], sizes = [8, 32], strides = [1, 1]} : vector<16x32xbf16> to vector<8x32xbf16>
    %cst_15 = arith.constant dense<0.000000e+00> : vector<8x16xf32>
    %12 = tpu.matmul %11, %2, %cst_15 {dimension_numbers = #tpu.dot_dimension_numbers<[1], [0], [0], [1], [0, 0, 1, 1], [], []>} : vector<8x32xbf16>, vector<32x16xbf16>, vector<8x16xf32> -> vector<8x16xf32>
    %13 = vector.extract_strided_slice %0 {offsets = [0, 0], sizes = [56, 32], strides = [1, 1]} : vector<64x32xbf16> to vector<56x32xbf16>
    %cst_16 = arith.constant dense<0.000000e+00> : vector<56x16xf32>
    %14 = tpu.matmul %13, %2, %cst_16 {dimension_numbers = #tpu.dot_dimension_numbers<[1], [0], [0], [1], [0, 0, 1, 1], [], []>} : vector<56x32xbf16>, vector<32x16xbf16>, vector<56x16xf32> -> vector<56x16xf32>
    %15 = tpu.concatenate %12, %14 in 0 : vector<8x16xf32>, vector<56x16xf32> -> vector<64x16xf32>
    %16 = arith.addf %10, %15 : vector<64x16xf32>
    %17 = vector.extract_strided_slice %1 {offsets = [0, 0], sizes = [8, 32], strides = [1, 1]} : vector<16x32xbf16> to vector<8x32xbf16>
    %cst_17 = arith.constant dense<0.000000e+00> : vector<8x16xf32>
    %18 = tpu.matmul %17, %2, %cst_17 {dimension_numbers = #tpu.dot_dimension_numbers<[1], [0], [0], [1], [0, 0, 1, 1], [], []>} : vector<8x32xbf16>, vector<32x16xbf16>, vector<8x16xf32> -> vector<8x16xf32>
    %19 = vector.extract_strided_slice %1 {offsets = [8, 0], sizes = [8, 32], strides = [1, 1]} : vector<16x32xbf16> to vector<8x32xbf16>
    %cst_18 = arith.constant dense<0.000000e+00> : vector<8x16xf32>
    %20 = tpu.matmul %19, %3, %cst_18 {dimension_numbers = #tpu.dot_dimension_numbers<[1], [0], [0], [1], [0, 0, 1, 1], [], []>} : vector<8x32xbf16>, vector<32x16xbf16>, vector<8x16xf32> -> vector<8x16xf32>
    %21 = arith.addf %18, %20 : vector<8x16xf32>
    %22 = vector.broadcast %6 : vector<1x16xf32> to vector<8x16xf32>
    %23 = arith.addf %21, %22 : vector<8x16xf32>
    %c0_i32 = arith.constant 0 : i32
    %24 = arith.cmpi eq, %arg0, %c0_i32 : i32
    %c0_19 = arith.constant 0 : index
    %c0_20 = arith.constant 0 : index
    %25 = vector.load %arg3[%c0_19, %c0_20] : memref<8x16xf32, #tpu.memory_space<vmem>>, vector<8x16xf32>
    %26 = arith.select %24, %25, %23 : vector<8x16xf32>
    %27 = arith.truncf %16 : vector<64x16xf32> to vector<64x16xbf16>
    %28 = arith.truncf %26 : vector<8x16xf32> to vector<8x16xbf16>
    %29 = vector.extract_strided_slice %27 {offsets = [0, 0], sizes = [56, 16], strides = [1, 1]} : vector<64x16xbf16> to vector<56x16xbf16>
    %30 = tpu.concatenate %28, %29 in 0 : vector<8x16xbf16>, vector<56x16xbf16> -> vector<64x16xbf16>
    %cst_21 = arith.constant dense<0.000000e+00> : vector<64x32xf32>
    %31 = tpu.matmul %30, %4, %cst_21 {dimension_numbers = #tpu.dot_dimension_numbers<[1], [0], [0], [1], [0, 0, 1, 1], [], []>} : vector<64x16xbf16>, vector<16x32xbf16>, vector<64x32xf32> -> vector<64x32xf32>
    %cst_22 = arith.constant dense<0.000000e+00> : vector<64x32xf32>
    %32 = tpu.matmul %27, %5, %cst_22 {dimension_numbers = #tpu.dot_dimension_numbers<[1], [0], [0], [1], [0, 0, 1, 1], [], []>} : vector<64x16xbf16>, vector<16x32xbf16>, vector<64x32xf32> -> vector<64x32xf32>
    %33 = arith.addf %31, %32 : vector<64x32xf32>
    %34 = vector.broadcast %7 : vector<1x32xf32> to vector<64x32xf32>
    %35 = arith.addf %33, %34 : vector<64x32xf32>
    %36 = arith.extf %0 : vector<64x32xbf16> to vector<64x32xf32>
    %37 = arith.addf %35, %36 : vector<64x32xf32>
    %38 = arith.mulf %37, %37 : vector<64x32xf32>
    %cst_23 = arith.constant dense<0.000000e+00> : vector<64xf32>
    %39 = vector.multi_reduction <add>, %38, %cst_23 [1] : vector<64x32xf32> to vector<64xf32>
    %40 = vector.shape_cast %39 : vector<64xf32> to vector<64x1xf32>
    %cst_24 = arith.constant 3.200000e+01 : f32
    %41 = vector.broadcast %cst_24 : f32 to vector<64x1xf32>
    %42 = arith.divf %40, %41 : vector<64x1xf32>
    %cst_25 = arith.constant 9.99999997E-7 : f32
    %43 = vector.broadcast %cst_25 : f32 to vector<64x1xf32>
    %44 = arith.addf %42, %43 : vector<64x1xf32>
    %45 = math.rsqrt %44 : vector<64x1xf32>
    %46 = vector.broadcast %45 : vector<64x1xf32> to vector<64x32xf32>
    %47 = arith.mulf %37, %46 : vector<64x32xf32>
    %c0_26 = arith.constant 0 : index
    %c0_27 = arith.constant 0 : index
    %48 = vector.load %arg10[%c0_26, %c0_27] : memref<1x32xf32, #tpu.memory_space<vmem>>, vector<1x32xf32>
    %49 = vector.broadcast %48 : vector<1x32xf32> to vector<64x32xf32>
    %50 = arith.mulf %49, %47 : vector<64x32xf32>
    %c0_28 = arith.constant 0 : index
    %c0_29 = arith.constant 0 : index
    %51 = vector.load %arg11[%c0_28, %c0_29] : memref<64x32xf32, #tpu.memory_space<vmem>>, vector<64x32xf32>
    tpu.vector_store %arg11[%c0_28, %c0_29], %50 {strides = array<i32>} : memref<64x32xf32, #tpu.memory_space<vmem>>, vector<64x32xf32>,
    return
  }
  func.func @transform_0(%arg0: i32) -> (i32, i32) {
    %c0_i32 = arith.constant 0 : i32
    %c0_i32_0 = arith.constant 0 : i32
    return %arg0, %c0_i32 : i32, i32
  }
  func.func @transform_1(%arg0: i32) -> (i32, i32) {
    %c0_i32 = arith.constant 0 : i32
    %c0_i32_0 = arith.constant 0 : i32
    return %arg0, %c0_i32 : i32, i32
  }
  func.func @transform_2(%arg0: i32) -> (i32, i32) {
    %c0_i32 = arith.constant 0 : i32
    %c0_i32_0 = arith.constant 0 : i32
    %c0_i32_1 = arith.constant 0 : i32
    return %c0_i32, %c0_i32_0 : i32, i32
  }
  func.func @transform_3(%arg0: i32) -> (i32, i32) {
    %c0_i32 = arith.constant 0 : i32
    %c0_i32_0 = arith.constant 0 : i32
    %c0_i32_1 = arith.constant 0 : i32
    return %c0_i32, %c0_i32_0 : i32, i32
  }
  func.func @transform_4(%arg0: i32) -> (i32, i32) {
    %c0_i32 = arith.constant 0 : i32
    %c0_i32_0 = arith.constant 0 : i32
    %c0_i32_1 = arith.constant 0 : i32
    return %c0_i32, %c0_i32_0 : i32, i32
  }
  func.func @transform_5(%arg0: i32) -> (i32, i32) {
    %c0_i32 = arith.constant 0 : i32
    %c0_i32_0 = arith.constant 0 : i32
    %c0_i32_1 = arith.constant 0 : i32
    return %c0_i32, %c0_i32_0 : i32, i32
  }
  func.func @transform_6(%arg0: i32) -> (i32, i32) {
    %c0_i32 = arith.constant 0 : i32
    %c0_i32_0 = arith.constant 0 : i32
    %c0_i32_1 = arith.constant 0 : i32
    return %c0_i32, %c0_i32_0 : i32, i32
  }
  func.func @transform_7(%arg0: i32) -> (i32, i32) {
    %c0_i32 = arith.constant 0 : i32
    %c0_i32_0 = arith.constant 0 : i32
    %c0_i32_1 = arith.constant 0 : i32
    return %c0_i32, %c0_i32_0 : i32, i32
  }
  func.func @transform_8(%arg0: i32) -> (i32, i32) {
    %c0_i32 = arith.constant 0 : i32
    %c0_i32_0 = arith.constant 0 : i32
    %c0_i32_1 = arith.constant 0 : i32
    return %c0_i32, %c0_i32_0 : i32, i32
  }
  func.func @transform_9(%arg0: i32) -> (i32, i32) {
    %c0_i32 = arith.constant 0 : i32
    %c0_i32_0 = arith.constant 0 : i32
    %c0_i32_1 = arith.constant 0 : i32
    return %c0_i32, %c0_i32_0 : i32, i32
  }
  func.func @transform_10(%arg0: i32) -> (i32, i32) {
    %c0_i32 = arith.constant 0 : i32
    %c0_i32_0 = arith.constant 0 : i32
    return %arg0, %c0_i32 : i32, i32
  }
}

</mosaic_0001>

<bundles_post_ra>
// kernel: tpu_custom_call.1
= control target key start
LH: loop header
LB: loop body
LE: loop exit
PB: predicated region body
PF: predicated region fallthrough
CT: control target
= control target key end

     0   :  { %vm95_vm0 = vcmask 261120   ;;  %vm284_vm1 = vcmask 130048   ;;  %vm268_vm2 = vcmask 1043456   ;;  %s905_s4 = inlined_call_operand.vmem [shape: bf16[32,16], index: 4, kind: input, shape index: {}]   ;;  %s906_s3 = inlined_call_operand.vmem [shape: bf16[32,16], index: 3, kind: input, shape index: {}]   ;;  %s907_s5 = inlined_call_operand.vmem [shape: f32[1,16], index: 5, kind: input, shape index: {}]   ;;  %s908_s1 = inlined_call_operand.vmem [shape: bf16[64,32], index: 1, kind: input, shape index: {}]   ;;  %s909_s0 = inlined_call_operand.vmem [shape: bf16[16,32], index: 0, kind: input, shape index: {}]   ;;  %s910_s7 = inlined_call_operand.vmem [shape: bf16[16,32], index: 7, kind: input, shape index: {}]   ;;  %s911_s6 = inlined_call_operand.vmem [shape: bf16[16,32], index: 6, kind: input, shape index: {}]   ;;  %s912_s2 = inlined_call_operand.vmem [shape: f32[8,16], index: 2, kind: input, shape index: {}]   ;;  %s913_s8 = inlined_call_operand.vmem [shape: f32[1,32], index: 8, kind: input, shape index: {}]   ;;  %s914_s9 = inlined_call_operand.vmem [shape: f32[1,32], index: 9, kind: input, shape index: {}]   ;;  %s915_s10 = inlined_call_operand.vmem [shape: f32[64,32], index: 10, kind: output, shape index: {}]  }
   0x1   :  { %v627_v0 = vld [vmem:[%s905_s4 + $0x8] sm:$0xff]  ;;  %v626_v2 = vld [vmem:[%s905_s4] sm:$0xff]  ;;  %v623_v7 = vld [vmem:[%s908_s1 + $0x10] sm:$0xff] }
   0x2   :  { %v625_v1 = vld [vmem:[%s906_s3 + $0x8] sm:$0xff]  ;;  %114 = vmatpush.bf16.msra.mxu0 %v627_v0  ;;  %v624_v3 = vld [vmem:[%s906_s3] sm:$0xff]  ;;  %211 = vmatpush.bf16.msra.mxu3 %v627_v0  ;;  %v742_v8 = vld [vmem:[%s908_s1 + $0x18] sm:$0xf] }
   0x3   :  { %175 = vmatpush.bf16.msra.mxu2 %v625_v1  ;;  %227 = vmatpush.bf16.msra.mxu1 %v625_v1  ;;  %v621_v4 = vld [vmem:[%s908_s1] sm:$0xff]  ;;  %v622_v5 = vld [vmem:[%s908_s1 + $0x8] sm:$0xff]  ;;  %v747_v9 = vld [vmem:[%s908_s1 + $0x1c] sm:$0xf]  ;;  %v77_v10 = vunpack.c.l.b16 %v742_v8 }
   0x4   :  { %v45_v6 = vld [vmem:[%s909_s0 + $0x4] sm:$0xf]  ;;  %v78_v11 = vunpack.c.l.b16 %v747_v9  ;;  %v631_v17 = vld [vmem:[%s907_s5] ss:$0 sm:$0xff] }
   0x5   :  { %v165_v13 = vpack.c.b16 %v77_v10, %v77_v10  ;;  %v44_v27 = vld [vmem:[%s909_s0] sm:$0xf] }
   0x6   :  { %115 = vmatpush.bf16.msra.mxu0 %v626_v2  ;;  %212 = vmatpush.bf16.msra.mxu3 %v626_v2  ;;  %v82_v12 = vpack.c.b16 %v78_v11, %v77_v10  ;;  %v629_v34 = vld [vmem:[%s910_s7] sm:$0xff] }
   0x7   :  { %176 = vmatpush.bf16.msra.mxu2 %v624_v3  ;;  %228 = vmatpush.bf16.msra.mxu1 %v624_v3  ;;  %v628_v43 = vld [vmem:[%s911_s6] sm:$0xff] }
   0x8   :  { %v236_v11 = vld [vmem:[%s912_s2] sm:$0xff] }
   0x9   :  { %586 = vmatmul.msk.bf16.vlgmr.msra.gmra.mxu0 %vm95_vm0, %v621_v4  ;;  %603 = vmatmul.msk.bf16.vlgmr.msra.gmra.mxu3 %vm95_vm0, %v45_v6 }
   0xa   :  { %158 = vmatpush.bf16.msrb.mxu0 %v625_v1  ;;  %599 = vmatmul.msk.bf16.vlgmr.msra.gmra.mxu2 %vm95_vm0, %v621_v4 }
   0xb   :  { %604 = vmatmul.msk.bf16.vlgmr.msra.gmra.mxu1 %vm95_vm0, %v44_v27  ;;  %304 = vmatpush.bf16.msrb.mxu3 %v629_v34 }
   0xc   :  { %350 = vmatpush.bf16.msrb.mxu1 %v628_v43 }
   0xe   :  { %159 = vmatpush.bf16.msrb.mxu0 %v624_v3 }
  0x19   :  { %587 = vmatmul.msk.bf16.gmra.mxu0 %vm95_vm0, %v622_v5 }
  0x1a   :  { %600 = vmatmul.msk.bf16.gmra.mxu2 %vm95_vm0, %v622_v5 }
  0x29   :  { %588 = vmatmul.msk.bf16.gmra.mxu0 %vm95_vm0, %v623_v7 }
  0x2a   :  { %601 = vmatmul.msk.bf16.gmra.mxu2 %vm95_vm0, %v623_v7 }
  0x39   :  { %589 = vmatmul.msk.bf16.gmra.mxu0 %vm95_vm0, %v82_v12 }
  0x3a   :  { %602 = vmatmul.msk.bf16.gmra.mxu2 %vm95_vm0, %v165_v13 }
  0x49   :  { %598 = vmatmul.msk.bf16.vlgmr.msrb.gmra.mxu0 %vm95_vm0, %v45_v6 }
  0x86   :  { %v117_v14 = vpop.f32.mrf.mxu0 }
  0x87   :  { %v118_v4 = vadd.f32 %v631_v17, %v117_v14 }
  0x88   :  { %v230_v14 = vpop.f32.mrf.mxu1 }
  0x8c   :  { %v214_v30 = vpop.f32.mrf.mxu3 }
  0x8d   :  { %v178_v15 = vpop.f32.mrf.mxu2 }
  0x8e   :  { %v119_v16 = vpop.f32.mrf.mxu0 }
  0x8f   :  { %v120_v18 = vadd.f32 %v631_v17, %v119_v16 }
  0x91   :  { %v198_v20 = vadd.f32 %v178_v15, %v120_v18  ;;  %v249_v15 = vpack.c.bf16 %v236_v11, %v236_v11 }
  0x93   :  { %v242_v23 = vpack.c.bf16 %v198_v20, %v198_v20 }
  0x94   :  { %v216_v39 = vpop.f32.mrf.mxu3 }
  0x95   :  { %v180_v19 = vpop.f32.mrf.mxu2  ;;  %v760_v28 = vunpack.c.l.b16 %v242_v23  ;;  %v784_v23 = vld [vmem:[%s913_s8] ss:$0 sm:$0xff] }
  0x96   :  { %v122_v21 = vpop.f32.mrf.mxu0 }
  0x97   :  { %v123_v22 = vadd.f32 %v631_v17, %v122_v21 }
  0x99   :  { %v199_v24 = vadd.f32 %v180_v19, %v123_v22  ;;  %v36_v22 = vld [vmem:[%s908_s1] sm:$0xff]  }
  0x9a   :  { %v384_v34 = vunpack.c.h.bf16 %v36_v22 }
  0x9b   :  { %v243_v25 = vpack.c.bf16 %v199_v24, %v199_v24 }
  0x9d   :  { %v183_v26 = vpop.f32.mrf.mxu2  ;;  %v762_v29 = vunpack.c.l.b16 %v243_v25 }
  0x9e   :  { %v124_v31 = vpop.f32.mrf.mxu0 }
  0x9f   :  { %v265_v32 = vpack.c.b16 %v762_v29, %v760_v28  ;;  %v125_v33 = vadd.f32 %v631_v17, %v124_v31 }
  0xa1   :  { %v200_v35 = vadd.f32 %v183_v26, %v125_v33  ;;  %v383_v26 = vunpack.c.l.bf16 %v36_v22  ;;  %v390_v22 = vunpack.c.l.bf16 %v747_v9 }
  0xa3   :  { %v244_v36 = vpack.c.bf16 %v200_v35, %v200_v35 }
  0xa5   :  { %v185_v37 = vpop.f32.mrf.mxu2  ;;  %v260_v38 = vunpack.c.l.b16 %v244_v36 }
  0xa6   :  { %v127_v40 = vpop.f32.mrf.mxu0 }
  0xa7   :  { %v275_v41 = vpack.c.b16 %v260_v38, %v762_v29  ;;  %v128_v42 = vadd.f32 %v631_v17, %v127_v40 }
  0xa9   :  { %v201_v44 = vadd.f32 %v185_v37, %v128_v42 }
  0xab   :  { %v245_v45 = vpack.c.bf16 %v201_v44, %v201_v44 }
  0xad   :  { %v188_v46 = vpop.f32.mrf.mxu2  ;;  %v261_v47 = vunpack.c.l.b16 %v245_v45 }
  0xae   :  { %v129_v48 = vpop.f32.mrf.mxu0 }
  0xaf   :  { %v266_v49 = vpack.c.b16 %v261_v47, %v260_v38  ;;  %v130_v50 = vadd.f32 %v631_v17, %v129_v48  ;;  %v38_v38 = vld [vmem:[%s908_s1 + $0x8] sm:$0xff]  }
  0xb0   :  { %v385_v43 = vunpack.c.l.bf16 %v38_v38 }
  0xb1   :  { %v202_v51 = vadd.f32 %v188_v46, %v130_v50 }
  0xb3   :  { %v246_v52 = vpack.c.bf16 %v202_v51, %v202_v51  ;;  %v386_v51 = vunpack.c.h.bf16 %v38_v38 }
  0xb5   :  { %v190_v53 = vpop.f32.mrf.mxu2  ;;  %v262_v54 = vunpack.c.l.b16 %v246_v52 }
  0xb6   :  { %v132_v55 = vpop.f32.mrf.mxu0 }
  0xb7   :  { %v276_v56 = vpack.c.b16 %v262_v54, %v261_v47  ;;  %v133_v57 = vadd.f32 %v631_v17, %v132_v55  ;;  %v40_v55 = vld [vmem:[%s908_s1 + $0x10] sm:$0xff]  }
  0xb9   :  { %v203_v58 = vadd.f32 %v190_v53, %v133_v57 }
  0xbb   :  { %v247_v59 = vpack.c.bf16 %v203_v58, %v203_v58 }
  0xbd   :  { %v193_v60 = vpop.f32.mrf.mxu2  ;;  %v263_v61 = vunpack.c.l.b16 %v247_v59 }
  0xbe   :  { %v134_v62 = vpop.f32.mrf.mxu0 }
  0xbf   :  { %v267_v63 = vpack.c.b16 %v263_v61, %v262_v54  ;;  %v135_v0 = vadd.f32 %v631_v17, %v134_v62  ;;  %v232_v17 = vpop.f32.mrf.mxu1 }
  0xc1   :  { %v204_v1 = vadd.f32 %v193_v60, %v135_v0  ;;  %v387_v60 = vunpack.c.l.bf16 %v40_v55 }
  0xc3   :  { %v248_v2 = vpack.c.bf16 %v204_v1, %v204_v1 }
  0xc5   :  { %v195_v3 = vpop.f32.mrf.mxu2  ;;  %v273_v5 = vunpack.c.l.b16 %v248_v2 }
  0xc6   :  { %v161_v6 = vpop.f32.mrf.mxu0 }
  0xc7   :  { %v277_v7 = vpack.c.b16 %v273_v5, %v263_v61  ;;  %v197_v10 = vadd.f32 %v161_v6, %v118_v4  ;;  %v388_v4 = vunpack.c.h.bf16 %v40_v55 }
  0xc9   :  { %v241_v12 = vpack.c.bf16 %v197_v10, %v197_v10 }
  0xcb   :  { %v257_v13 = vunpack.c.l.b16 %v241_v12 }
  0xcd   :  { %v264_v16 = vpack.c.b16 %v257_v13, %v257_v13  ;;  %v274_v18 = vpack.c.b16 %v760_v28, %v257_v13 }
  0xce   :  { %v163_v19 = vpop.f32.mrf.mxu0 }
  0xcf   :  { %609 = vmatmul.msk.bf16.vlgmr.msrb.gmra.mxu3 %vm284_vm1, %v274_v18  ;;  %v271_v20 = vsel %vm268_vm2, %v249_v15, %v264_v16  ;;  %v389_v15 = vunpack.c.l.bf16 %v742_v8 }
  0xd0   :  { %617 = vmatmul.msk.bf16.vlgmr.msrb.gmra.mxu1 %vm284_vm1, %v271_v20 }
  0xdf   :  { %610 = vmatmul.msk.bf16.gmra.mxu3 %vm284_vm1, %v275_v41 }
  0xe0   :  { %618 = vmatmul.msk.bf16.gmra.mxu1 %vm284_vm1, %v265_v32 }
  0xef   :  { %611 = vmatmul.msk.bf16.gmra.mxu3 %vm284_vm1, %v276_v56 }
  0xf0   :  { %619 = vmatmul.msk.bf16.gmra.mxu1 %vm284_vm1, %v266_v49 }
  0xff   :  { %612 = vmatmul.msk.bf16.gmra.mxu3 %vm284_vm1, %v277_v7 }
 0x100   :  { %620 = vmatmul.msk.bf16.gmra.mxu1 %vm284_vm1, %v267_v63 }
 0x14d   :  { %v352_v21 = vpop.f32.mrf.mxu1 }
 0x152   :  { %v306_v24 = vpop.f32.mrf.mxu3 }
 0x153   :  { %v353_v25 = vadd.f32 %v352_v21, %v306_v24 }
 0x155   :  { %v375_v27 = vadd.f32 %v784_v23, %v353_v25  ;;  %v354_v28 = vpop.f32.mrf.mxu1 }
 0x157   :  { %v787_v29 = vadd.f32 %v383_v26, %v375_v27  ;;  %v652_v27 = vmov 32.0  }
 0x158   :  { %634 = vrcp.f32 %v652_v27 }
 0x159   :  { %v399_v30 = vmul.f32 %v787_v29, %v787_v29 }
 0x15a   :  { %v308_v31 = vpop.f32.mrf.mxu3 }
 0x15b   :  { %v355_v32 = vadd.f32 %v354_v28, %v308_v31  ;;  %v407_v33 = vsel %vm95_vm0, %v399_v30, 0.0 }
 0x15c   :  { %408 = vadd.xlane.f32.xlu0 %v407_v33 }
 0x15d   :  { %v376_v35 = vadd.f32 %v784_v23, %v355_v32  ;;  %v357_v36 = vpop.f32.mrf.mxu1 }
 0x15e   :  { %v635_v28 = vpop.eup %634 }
 0x15f   :  { %v793_v37 = vadd.f32 %v384_v34, %v376_v35  ;;  %v432_v30 = vmul.f32 32.0, %v635_v28  ;;  %vm436_vm3 = vweird.f32 %v635_v28 }
 0x161   :  { %v400_v39 = vmul.f32 %v793_v37, %v793_v37  ;;  %v433_v31 = vsub.f32 1.0, %v432_v30 }
 0x162   :  { %v311_v40 = vpop.f32.mrf.mxu3 }
 0x163   :  { %v358_v41 = vadd.f32 %v357_v36, %v311_v40  ;;  %v410_v42 = vsel %vm95_vm0, %v400_v39, 0.0  ;;  %v434_v32 = vmul.f32 %v635_v28, %v433_v31 }
 0x164   :  { %411 = vadd.xlane.f32.xlu0 %v410_v42 }
 0x165   :  { %v377_v44 = vadd.f32 %v784_v23, %v358_v41  ;;  %v359_v45 = vpop.f32.mrf.mxu1  ;;  %v435_v33 = vadd.f32 %v635_v28, %v434_v32 }
 0x167   :  { %v802_v46 = vadd.f32 %v385_v43, %v377_v44  ;;  %v842_v9 = vsel %vm436_vm3, %v635_v28, %v435_v33 }
 0x169   :  { %v401_v47 = vmul.f32 %v802_v46, %v802_v46 }
 0x16a   :  { %v313_v48 = vpop.f32.mrf.mxu3 }
 0x16b   :  { %v360_v49 = vadd.f32 %v359_v45, %v313_v48  ;;  %v413_v50 = vsel %vm95_vm0, %v401_v47, 0.0 }
 0x16c   :  { %414 = vadd.xlane.f32.xlu1 %v413_v50 }
 0x16d   :  { %v378_v52 = vadd.f32 %v784_v23, %v360_v49  ;;  %v362_v53 = vpop.f32.mrf.mxu1 }
 0x16f   :  { %v808_v54 = vadd.f32 %v386_v51, %v378_v52  ;;  %v850_v52 = vld [vmem:[%s914_s9] ss:$0 sm:$0xff] }
 0x171   :  { %v402_v56 = vmul.f32 %v808_v54, %v808_v54 }
 0x172   :  { %v316_v57 = vpop.f32.mrf.mxu3 }
 0x173   :  { %v363_v58 = vadd.f32 %v362_v53, %v316_v57  ;;  %v416_v59 = vsel %vm95_vm0, %v402_v56, 0.0 }
 0x174   :  { %417 = vadd.xlane.f32.xlu1 %v416_v59 }
 0x175   :  { %v379_v61 = vadd.f32 %v784_v23, %v363_v58  ;;  %v364_v62 = vpop.f32.mrf.mxu1 }
 0x177   :  { %v817_v63 = vadd.f32 %v387_v60, %v379_v61 }
 0x179   :  { %v403_v0 = vmul.f32 %v817_v63, %v817_v63 }
 0x17a   :  { %v318_v1 = vpop.f32.mrf.mxu3 }
 0x17b   :  { %v365_v2 = vadd.f32 %v364_v62, %v318_v1  ;;  %v419_v3 = vsel %vm95_vm0, %v403_v0, 0.0 }
 0x17c   :  { %420 = vadd.xlane.f32.xlu2 %v419_v3 }
 0x17d   :  { %v380_v5 = vadd.f32 %v784_v23, %v365_v2  ;;  %v367_v7 = vpop.f32.mrf.mxu1 }
 0x17f   :  { %v823_v6 = vadd.f32 %v388_v4, %v380_v5 }
 0x181   :  { %v404_v10 = vmul.f32 %v823_v6, %v823_v6 }
 0x182   :  { %v321_v11 = vpop.f32.mrf.mxu3 }
 0x183   :  { %v368_v12 = vadd.f32 %v367_v7, %v321_v11  ;;  %v422_v13 = vsel %vm95_vm0, %v404_v10, 0.0 }
 0x184   :  { %423 = vadd.xlane.f32.xlu2 %v422_v13 }
 0x185   :  { %v381_v16 = vadd.f32 %v784_v23, %v368_v12  ;;  %v369_v20 = vpop.f32.mrf.mxu1 }
 0x187   :  { %v830_v18 = vadd.f32 %v389_v15, %v381_v16 }
 0x189   :  { %v405_v19 = vmul.f32 %v830_v18, %v830_v18 }
 0x18a   :  { %v323_v14 = vpop.f32.mrf.mxu3 }
 0x18b   :  { %v370_v17 = vadd.f32 %v369_v20, %v323_v14  ;;  %v425_v21 = vsel %vm95_vm0, %v405_v19, 0.0 }
 0x18c   :  { %426 = vadd.xlane.f32.xlu0 %v425_v21 }
 0x18d   :  { %v382_v24 = vadd.f32 %v784_v23, %v370_v17 }
 0x18f   :  { %v837_v25 = vadd.f32 %v390_v22, %v382_v24 }
 0x191   :  { %v406_v8 = vmul.f32 %v837_v25, %v837_v25 }
 0x193   :  { %v428_v26 = vsel %vm95_vm0, %v406_v8, 0.0 }
 0x194   :  { %429 = vadd.xlane.f32.xlu1 %v428_v26 }
 0x1cf   :  { %v409_v34 = vpop.xlane.xlu0 %408 }
 0x1d0   :  { %v438_v23 = vmul.f32 %v842_v9, %v409_v34 }
 0x1d2   :  { %v446_v35 = vadd.f32 1e-06, %v438_v23 }
 0x1d4   :  { %636 = vrsqrt.f32 %v446_v35  ;;  %vm460_vm5 = vweird.f32 %v446_v35 }
 0x1d7   :  { %v412_v36 = vpop.xlane.xlu0 %411 }
 0x1d8   :  { %v439_v38 = vmul.f32 %v842_v9, %v412_v36 }
 0x1da   :  { %v637_v39 = vpop.eup %636  ;;  %v447_v40 = vadd.f32 1e-06, %v439_v38 }
 0x1db   :  { %v455_v41 = vmul.f32 %v637_v39, %v446_v35  ;;  %vm461_vm4 = vweird.f32 %v637_v39 }
 0x1dc   :  { %638 = vrsqrt.f32 %v447_v40  ;;  %vm462_vm6 = vmor %vm460_vm5, %vm461_vm4  ;;  %vm470_vm8 = vweird.f32 %v447_v40 }
 0x1dd   :  { %v456_v42 = vmul.f32 %v637_v39, %v455_v41 }
 0x1df   :  { %v457_v43 = vmul.f32 0.5, %v456_v42  ;;  %v415_v44 = vpop.xlane.xlu1 %414 }
 0x1e0   :  { %v440_v45 = vmul.f32 %v842_v9, %v415_v44 }
 0x1e1   :  { %v458_v47 = vsub.f32 1.5, %v457_v43 }
 0x1e2   :  { %v639_v48 = vpop.eup %638  ;;  %v448_v49 = vadd.f32 1e-06, %v440_v45 }
 0x1e3   :  { %v459_v50 = vmul.f32 %v637_v39, %v458_v47  ;;  %v465_v51 = vmul.f32 %v639_v48, %v447_v40  ;;  %vm471_vm7 = vweird.f32 %v639_v48 }
 0x1e4   :  { %640 = vrsqrt.f32 %v448_v49  ;;  %vm472_vm9 = vmor %vm470_vm8, %vm471_vm7  ;;  %vm480_vm11 = vweird.f32 %v448_v49 }
 0x1e5   :  { %v463_v53 = vsel %vm462_vm6, %v637_v39, %v459_v50  ;;  %v466_v55 = vmul.f32 %v639_v48, %v465_v51 }
 0x1e6   :  { %v534_v56 = vmul.f32 %v463_v53, %v787_v29 }
 0x1e7   :  { %v467_v57 = vmul.f32 0.5, %v466_v55  ;;  %v418_v58 = vpop.xlane.xlu1 %417 }
 0x1e8   :  { %v546_v59 = vmul.f32 %v850_v52, %v534_v56  ;;  %v441_v60 = vmul.f32 %v842_v9, %v418_v58 }
 0x1e9   :  { %v468_v61 = vsub.f32 1.5, %v467_v57 }
 0x1ea   :  { %v641_v62 = vpop.eup %640  ;;  %554 = vst.msk [vmem:[%s915_s10] sm:$0xff] %vm95_vm0, %v546_v59  ;;  %v449_v0 = vadd.f32 1e-06, %v441_v60 }
 0x1eb   :  { %v469_v1 = vmul.f32 %v639_v48, %v468_v61  ;;  %v475_v2 = vmul.f32 %v641_v62, %v448_v49  ;;  %vm481_vm10 = vweird.f32 %v641_v62 }
 0x1ec   :  { %642 = vrsqrt.f32 %v449_v0  ;;  %vm482_vm12 = vmor %vm480_vm11, %vm481_vm10  ;;  %vm490_vm14 = vweird.f32 %v449_v0 }
 0x1ed   :  { %v473_v29 = vsel %vm472_vm9, %v639_v48, %v469_v1  ;;  %v476_v3 = vmul.f32 %v641_v62, %v475_v2 }
 0x1ee   :  { %v535_v4 = vmul.f32 %v473_v29, %v793_v37 }
 0x1ef   :  { %v477_v5 = vmul.f32 0.5, %v476_v3  ;;  %v421_v7 = vpop.xlane.xlu2 %420 }
 0x1f0   :  { %v547_v10 = vmul.f32 %v850_v52, %v535_v4  ;;  %v442_v11 = vmul.f32 %v842_v9, %v421_v7 }
 0x1f1   :  { %v478_v12 = vsub.f32 1.5, %v477_v5 }
 0x1f2   :  { %v643_v13 = vpop.eup %642  ;;  %555 = vst.msk [vmem:[%s915_s10 + $0x8] sm:$0xff] %vm95_vm0, %v547_v10  ;;  %v450_v15 = vadd.f32 1e-06, %v442_v11 }
 0x1f3   :  { %v479_v16 = vmul.f32 %v641_v62, %v478_v12  ;;  %v485_v19 = vmul.f32 %v643_v13, %v449_v0  ;;  %vm491_vm13 = vweird.f32 %v643_v13 }
 0x1f4   :  { %644 = vrsqrt.f32 %v450_v15  ;;  %vm492_vm15 = vmor %vm490_vm14, %vm491_vm13  ;;  %vm500_vm2 = vweird.f32 %v450_v15 }
 0x1f5   :  { %v483_v37 = vsel %vm482_vm12, %v641_v62, %v479_v16  ;;  %v486_v20 = vmul.f32 %v643_v13, %v485_v19 }
 0x1f6   :  { %v536_v14 = vmul.f32 %v483_v37, %v802_v46 }
 0x1f7   :  { %v487_v17 = vmul.f32 0.5, %v486_v20  ;;  %v424_v21 = vpop.xlane.xlu2 %423 }
 0x1f8   :  { %v548_v22 = vmul.f32 %v850_v52, %v536_v14  ;;  %v443_v24 = vmul.f32 %v842_v9, %v424_v21 }
 0x1f9   :  { %v488_v8 = vsub.f32 1.5, %v487_v17 }
 0x1fa   :  { %v645_v26 = vpop.eup %644  ;;  %556 = vst.msk [vmem:[%s915_s10 + $0x10] sm:$0xff] %vm95_vm0, %v548_v22  ;;  %v451_v27 = vadd.f32 1e-06, %v443_v24 }
 0x1fb   :  { %v489_v28 = vmul.f32 %v643_v13, %v488_v8  ;;  %v495_v30 = vmul.f32 %v645_v26, %v450_v15  ;;  %vm501_vm1 = vweird.f32 %v645_v26 }
 0x1fc   :  { %646 = vrsqrt.f32 %v451_v27  ;;  %vm502_vm3 = vmor %vm500_vm2, %vm501_vm1  ;;  %vm510_vm5 = vweird.f32 %v451_v27 }
 0x1fd   :  { %v493_v46 = vsel %vm492_vm15, %v643_v13, %v489_v28  ;;  %v496_v31 = vmul.f32 %v645_v26, %v495_v30 }
 0x1fe   :  { %v537_v32 = vmul.f32 %v493_v46, %v808_v54 }
 0x1ff   :  { %v497_v33 = vmul.f32 0.5, %v496_v31  ;;  %v427_v34 = vpop.xlane.xlu0 %426 }
 0x200   :  { %v549_v23 = vmul.f32 %v850_v52, %v537_v32  ;;  %v444_v35 = vmul.f32 %v842_v9, %v427_v34 }
 0x201   :  { %v498_v36 = vsub.f32 1.5, %v497_v33 }
 0x202   :  { %v647_v38 = vpop.eup %646  ;;  %557 = vst.msk [vmem:[%s915_s10 + $0x18] sm:$0xff] %vm95_vm0, %v549_v23  ;;  %v452_v39 = vadd.f32 1e-06, %v444_v35 }
 0x203   :  { %v499_v40 = vmul.f32 %v645_v26, %v498_v36  ;;  %v505_v41 = vmul.f32 %v647_v38, %v451_v27  ;;  %vm511_vm4 = vweird.f32 %v647_v38 }
 0x204   :  { %648 = vrsqrt.f32 %v452_v39  ;;  %vm512_vm6 = vmor %vm510_vm5, %vm511_vm4  ;;  %vm520_vm8 = vweird.f32 %v452_v39 }
 0x205   :  { %v503_v54 = vsel %vm502_vm3, %v645_v26, %v499_v40  ;;  %v506_v42 = vmul.f32 %v647_v38, %v505_v41 }
 0x206   :  { %v538_v43 = vmul.f32 %v503_v54, %v817_v63 }
 0x207   :  { %v507_v44 = vmul.f32 0.5, %v506_v42  ;;  %v430_v45 = vpop.xlane.xlu1 %429 }
 0x208   :  { %v550_v47 = vmul.f32 %v850_v52, %v538_v43  ;;  %v445_v48 = vmul.f32 %v842_v9, %v430_v45 }
 0x209   :  { %v508_v49 = vsub.f32 1.5, %v507_v44 }
 0x20a   :  { %v649_v50 = vpop.eup %648  ;;  %558 = vst.msk [vmem:[%s915_s10 + $0x20] sm:$0xff] %vm95_vm0, %v550_v47  ;;  %v453_v51 = vadd.f32 1e-06, %v445_v48 }
 0x20b   :  { %v509_v53 = vmul.f32 %v647_v38, %v508_v49  ;;  %v515_v55 = vmul.f32 %v649_v50, %v452_v39  ;;  %vm521_vm7 = vweird.f32 %v649_v50 }
 0x20c   :  { %650 = vrsqrt.f32 %v453_v51  ;;  %vm522_vm9 = vmor %vm520_vm8, %vm521_vm7  ;;  %vm530_vm11 = vweird.f32 %v453_v51 }
 0x20d   :  { %v513_v63 = vsel %vm512_vm6, %v647_v38, %v509_v53  ;;  %v516_v56 = vmul.f32 %v649_v50, %v515_v55 }
 0x20e   :  { %v539_v57 = vmul.f32 %v513_v63, %v823_v6 }
 0x20f   :  { %v517_v58 = vmul.f32 0.5, %v516_v56 }
 0x210   :  { %v551_v9 = vmul.f32 %v850_v52, %v539_v57 }
 0x211   :  { %v518_v59 = vsub.f32 1.5, %v517_v58 }
 0x212   :  { %v651_v60 = vpop.eup %650  ;;  %559 = vst.msk [vmem:[%s915_s10 + $0x28] sm:$0xff] %vm95_vm0, %v551_v9 }
 0x213   :  { %v519_v61 = vmul.f32 %v649_v50, %v518_v59  ;;  %v525_v62 = vmul.f32 %v651_v60, %v453_v51  ;;  %vm531_vm10 = vweird.f32 %v651_v60 }
 0x214   :  { %vm532_vm12 = vmor %vm530_vm11, %vm531_vm10 }
 0x215   :  { %v523_v0 = vsel %vm522_vm9, %v649_v50, %v519_v61  ;;  %v526_v1 = vmul.f32 %v651_v60, %v525_v62 }
 0x216   :  { %v540_v2 = vmul.f32 %v523_v0, %v830_v18 }
 0x217   :  { %v527_v6 = vmul.f32 0.5, %v526_v1 }
 0x218   :  { %v552_v29 = vmul.f32 %v850_v52, %v540_v2 }
 0x219   :  { %v528_v3 = vsub.f32 1.5, %v527_v6 }
 0x21a   :  { %560 = vst.msk [vmem:[%s915_s10 + $0x30] sm:$0xff] %vm95_vm0, %v552_v29 }
 0x21b   :  { %v529_v4 = vmul.f32 %v651_v60, %v528_v3 }
 0x21d   :  { %v533_v5 = vsel %vm532_vm12, %v651_v60, %v529_v4 }
 0x21e   :  { %v541_v7 = vmul.f32 %v533_v5, %v837_v25 }
 0x220   :  { %v553_v10 = vmul.f32 %v850_v52, %v541_v7 }
 0x222   :  { %561 = vst.msk [vmem:[%s915_s10 + $0x38] sm:$0xff] %vm95_vm0, %v553_v10 }

</bundles_post_ra>
